<compile_context>
chip_gen: v7x
topology: tpu7x:2x2x1
jax: 0.10.0
libtpu: 0.0.40
codegen_flags: <defaults>
</compile_context>

<pallas_src>
import jax
import jax.numpy as jnp
import numpy as np
from jax.experimental import pallas as pl
from jax.experimental.pallas import tpu as pltpu


def _genrep_kernel(max_len_ref,                       # SMEM scalar prefetch: (B//tb,) i32
                   emb_ref, w_ref, b_ref,             # VMEM inputs
                   start_ref, invlen_ref,
                   out_ref):                          # VMEM output (accumulator)
    """One (batch block, H-out tile, S tile) grid step.

    emb_ref   : (tb, ts, H)  bf16  token embeddings for this batch block / S tile
    w_ref     : (H, tn)      bf16  dense weight tile of the synthetic backbone
    b_ref     : (1, tn)      f32   dense bias tile
    start_ref : (tb, 1, 1)   i32   first valid position (S - seq_len) per row
    invlen_ref: (tb, 1, 1)   f32   exact 1 / seq_len per row
    out_ref   : (tb, 1, tn)  f32   pooled embeddings; acts as the S-axis accumulator

    NOTE: correctness relies on the S (reduction) axis being the INNERMOST grid
    axis, marked "arbitrary", with init at si==0 and finalize at si==last.  Do
    not reorder grid axes or mark S as "parallel".
    """
    bi = pl.program_id(0)
    si = pl.program_id(2)
    tb, ts, H = emb_ref.shape
    tn = out_ref.shape[-1]
    S_total = ts * pl.num_programs(2)

    @pl.when(si == 0)
    def _init():
        out_ref[...] = jnp.zeros_like(out_ref)

    # Skip S tiles that are entirely left padding for every row in this block.
    # (Left padding => valid tokens are a contiguous suffix; a tile contributes
    # nothing iff tile_end <= S - max(seq_len) over the block.)
    tile_end = (si + 1) * ts

    @pl.when(tile_end > S_total - max_len_ref[bi])
    def _compute():
        # "last hidden states" of the synthetic causal LM: bf16 operands on the
        # MXU (autocast bf16), f32 accumulation, single large-M 2D dot.
        emb2d = emb_ref[...].reshape(tb * ts, H)                       # bf16
        h = jnp.dot(emb2d, w_ref[...],
                    preferred_element_type=jnp.float32)                # (tb*ts, tn) f32, MXU
        h = jnp.tanh(h + b_ref[...])                                   # VPU + EUP
        h = h.astype(jnp.bfloat16).astype(jnp.float32)                 # emulate bf16 model output
        h3 = h.reshape(tb, ts, tn)

        # In-kernel left-padding mask: position >= start  (no HBM mask input).
        pos = si * ts + jax.lax.broadcasted_iota(jnp.int32, (tb, ts, 1), 1)
        mask = (pos >= start_ref[...]).astype(jnp.float32)             # (tb, ts, 1)

        # _pool(pooling_mode='mean') partial sums, accumulated in the output block.
        out_ref[...] += jnp.sum(h3 * mask, axis=1, keepdims=True)      # (tb, 1, tn)

    @pl.when(si == pl.num_programs(2) - 1)
    def _finalize():
        # Exact divide: 1/len was computed once in f32 in the wrapper.
        out_ref[...] = out_ref[...] * invlen_ref[...]


def _largest_divisor_leq(n, cap):
    for d in range(min(n, cap), 0, -1):
        if n % d == 0:
            return d
    return 1


def genrep_forward(input_ids, attention_mask, embed_table, w, b,
                   *, block_b=None, block_s=None, block_h=None):
    """GenRep.forward with a synthetic backbone. Returns pooled embeddings (B, H) f32."""
    B, S = input_ids.shape
    V, H = embed_table.shape

    # ---- tile selection -----------------------------------------------------
    # ts: S (reduction) tile.  Kept at 128 so padded tiles can actually be
    #     skipped for short rows; must divide S (multiple of 8 for f32/bf16).
    ts = min(block_s, S) if block_s is not None else min(S, 128)
    assert S % ts == 0 and (ts % 8 == 0 or ts == S), "S tiling requires divisible, 8-aligned ts"

    # tn: H-out (lane) tile.  tn == H removes the emb re-read along the H-out
    #     axis; shrink only if the double-buffered bf16 weight tile would blow
    #     the scoped VMEM budget (sized for v7x's 64 MiB physical VMEM).
    tn = min(block_h, H) if block_h is not None else H
    while tn > 128 and (2 * H * tn * 2) > 24 * 1024 * 1024 and H % (tn // 2) == 0:
        tn //= 2
    assert H % tn == 0 and tn % 128 == 0, "H tiling requires tn | H and tn % 128 == 0"

    # tb: batch rows per grid step.  Aim for tb*ts >= 256 so the MXU M dim is
    #     filled on v6e/v7x (v5e's 128-wide MXU is fine either way).
    if block_b is None:
        tb = _largest_divisor_leq(B, max(1, 256 // ts))
    else:
        tb = block_b
    assert B % tb == 0

    # ---- inputs --------------------------------------------------------------
    # Embedding gather stays in the XLA wrapper but in bf16, so the (B,S,H)
    # activation round-trips HBM at half width and feeds the MXU directly.
    # TODO(synk): fuse the row gather into the kernel (scalar-prefetched ids +
    # manual DMA gather) to remove this HBM round trip entirely.
    emb = embed_table.astype(jnp.bfloat16)[input_ids]                  # (B, S, H) bf16
    w_bf = w.astype(jnp.bfloat16)                                      # (H, H)  bf16
    b_f32 = b.astype(jnp.float32).reshape(1, H)                        # (1, H)  f32

    seq_len = attention_mask.astype(jnp.int32).sum(axis=-1)            # (B,)
    start = (S - seq_len).astype(jnp.int32).reshape(B, 1, 1)           # first valid position
    inv_len = (1.0 / jnp.maximum(seq_len, 1).astype(jnp.float32)).reshape(B, 1, 1)
    # Per-batch-block max length drives the "skip fully-padded S tile" guard.
    block_max_len = seq_len.reshape(B // tb, tb).max(axis=1).astype(jnp.int32)

    grid = (B // tb, H // tn, S // ts)   # (parallel, parallel, reduction-innermost)

    out = pl.pallas_call(
        _genrep_kernel,
        out_shape=jax.ShapeDtypeStruct((B, 1, H), jnp.float32),
        grid_spec=pltpu.PrefetchScalarGridSpec(
            num_scalar_prefetch=1,
            grid=grid,
            in_specs=[
                pl.BlockSpec((tb, ts, H), lambda bi, ni, si, ml: (bi, si, 0)),  # emb
                pl.BlockSpec((H, tn),     lambda bi, ni, si, ml: (0, ni)),      # weight
                pl.BlockSpec((1, tn),     lambda bi, ni, si, ml: (0, ni)),      # bias
                pl.BlockSpec((tb, 1, 1),  lambda bi, ni, si, ml: (bi, 0, 0)),   # start pos
                pl.BlockSpec((tb, 1, 1),  lambda bi, ni, si, ml: (bi, 0, 0)),   # 1/len
            ],
            out_specs=pl.BlockSpec((tb, 1, tn), lambda bi, ni, si, ml: (bi, 0, ni)),
        ),
        compiler_params=pltpu.CompilerParams(
            # S axis MUST stay "arbitrary" (innermost reduction with a resident
            # output accumulator); batch / H-out axes shard across TCs.
            dimension_semantics=("parallel", "parallel", "arbitrary"),
            vmem_limit_bytes=48 * 1024 * 1024,   # < 64 MiB physical on v7x
        ),
    )(block_max_len, emb, w_bf, b_f32, start, inv_len)
    return out.reshape(B, H)


def genrep_forward_ref(input_ids, attention_mask, embed_table, w, b):
    """Pure-JAX reference mirroring GenRep._pool (mean mode) loop semantics."""
    emb = embed_table.astype(jnp.bfloat16)[input_ids].astype(jnp.float32)
    w_f = w.astype(jnp.bfloat16).astype(jnp.float32)
    h = jnp.tanh(
        jnp.einsum("bsh,hd->bsd", emb, w_f, precision=jax.lax.Precision.HIGHEST)
        + b.astype(jnp.float32)[None, :, :])
    h = h.astype(jnp.bfloat16).astype(jnp.float32)
    seq_lengths = attention_mask.sum(axis=-1)
    outs = []
    for i, length in enumerate(np.asarray(seq_lengths)):
        outs.append(h[i, -int(length):, :].mean(axis=0))     # last `length` tokens
    return jnp.stack(outs, axis=0)


if __name__ == "__main__":
    B, S, H, V = 2, 256, 128, 64   # batch, seq (max_length=256 in the module), hidden, vocab

    key = jax.random.PRNGKey(0)
    k_emb, k_w, k_b, k_ids = jax.random.split(key, 4)

    # Deterministic synthetic parameters (backbone stand-in, stored in bf16 like
    # a torch_dtype=bfloat16 HF model; bias kept f32).
    embed_table = (jax.random.normal(k_emb, (V, H), dtype=jnp.float32) * 0.05).astype(jnp.bfloat16)
    w = (jax.random.normal(k_w, (H, H), dtype=jnp.float32) * 0.05).astype(jnp.bfloat16)
    b = jax.random.normal(k_b, (1, H), dtype=jnp.float32) * 0.01

    # Left-padded batch (tokenizer.padding_side = 'left').
    input_ids = jax.random.randint(k_ids, (B, S), 0, V, dtype=jnp.int32)
    seq_lengths = np.array([S, 100], dtype=np.int32)
    mask = np.zeros((B, S), dtype=np.int32)
    for i, L in enumerate(seq_lengths):
        mask[i, S - L:] = 1
    attention_mask = jnp.asarray(mask)
    pad_id = 0
    input_ids = jnp.where(attention_mask == 1, input_ids, pad_id)

    # TODO(synk): the full HF causal-LM backbone / LoRA / tokenizer path has no
    # Pallas equivalent here; replaced by the deterministic single-layer stand-in.

    out = genrep_forward(input_ids, attention_mask, embed_table, w, b)
    out = jax.block_until_ready(out)

    ref = genrep_forward_ref(input_ids, attention_mask, embed_table, w, b)
    np.testing.assert_allclose(np.asarray(out), np.asarray(ref), rtol=2e-2, atol=2e-2)

    assert out.shape == (B, H) and out.dtype == jnp.float32
    print("KERNEL_OK")
</pallas_src>

<mosaic_0001>
module attributes {stable_mosaic.version = 11 : i64} {
  func.func @_genrep_kernel(%arg0: i32, %arg1: i32, %arg2: i32, %arg3: memref<1xi32, #tpu.memory_space<smem>>, %arg4: memref<2x128x128xbf16, #tpu.memory_space<vmem>>, %arg5: memref<128x128xbf16, #tpu.memory_space<vmem>>, %arg6: memref<1x128xf32, #tpu.memory_space<vmem>>, %arg7: memref<2x1x1xi32, #tpu.memory_space<vmem>>, %arg8: memref<2x1x1xf32, #tpu.memory_space<vmem>>, %arg9: memref<2x1x128xf32, #tpu.memory_space<vmem>>) attributes {dimension_semantics = [#tpu.dimension_semantics<parallel>, #tpu.dimension_semantics<parallel>, #tpu.dimension_semantics<arbitrary>], iteration_bounds = array<i64: 1, 1, 2>, scalar_prefetch = 1 : i64, scratch_operands = 0 : i64, tpu.core_type = #tpu.core_type<tc>, window_params = [{transform_indices = @transform_0, window_bounds = array<i64: 2, 128, 128>}, {transform_indices = @transform_1, window_bounds = array<i64: 128, 128>}, {transform_indices = @transform_2, window_bounds = array<i64: 1, 128>}, {transform_indices = @transform_3, window_bounds = array<i64: 2, 1, 1>}, {transform_indices = @transform_4, window_bounds = array<i64: 2, 1, 1>}, {transform_indices = @transform_5, window_bounds = array<i64: 2, 1, 128>}]} {
    %c0_i32 = arith.constant 0 : i32
    %0 = arith.cmpi eq, %arg2, %c0_i32 : i32
    %1 = arith.extui %0 : i1 to i32
    %c0_i32_0 = arith.constant 0 : i32
    %2 = arith.cmpi ne, %1, %c0_i32_0 : i32
    scf.if %2 {
      %cst = arith.constant 0.000000e+00 : f32
      %14 = vector.broadcast %cst : f32 to vector<2x1x128xf32>
      %c0 = arith.constant 0 : index
      %c0_4 = arith.constant 0 : index
      %c0_5 = arith.constant 0 : index
      %15 = vector.load %arg9[%c0, %c0_4, %c0_5] : memref<2x1x128xf32, #tpu.memory_space<vmem>>, vector<2x1x128xf32>
      tpu.vector_store %arg9[%c0, %c0_4, %c0_5], %14 {strides = array<i32>} : memref<2x1x128xf32, #tpu.memory_space<vmem>>, vector<2x1x128xf32>,
    } else {
    }
    %c1_i32 = arith.constant 1 : i32
    %3 = arith.addi %arg2, %c1_i32 : i32
    %c128_i32 = arith.constant 128 : i32
    %4 = arith.muli %3, %c128_i32 : i32
    %5 = arith.index_cast %arg0 : i32 to index
    %6 = memref.load %arg3[%5] : memref<1xi32, #tpu.memory_space<smem>>
    %c256_i32 = arith.constant 256 : i32
    %7 = arith.subi %c256_i32, %6 : i32
    %8 = arith.cmpi sgt, %4, %7 : i32
    %9 = arith.extui %8 : i1 to i32
    %c0_i32_1 = arith.constant 0 : i32
    %10 = arith.cmpi ne, %9, %c0_i32_1 : i32
    scf.if %10 {
      %c0 = arith.constant 0 : index
      %c0_4 = arith.constant 0 : index
      %c0_5 = arith.constant 0 : index
      %14 = vector.load %arg4[%c0, %c0_4, %c0_5] : memref<2x128x128xbf16, #tpu.memory_space<vmem>>, vector<2x128x128xbf16>
      %15 = vector.shape_cast %14 : vector<2x128x128xbf16> to vector<256x128xbf16>
      %c0_6 = arith.constant 0 : index
      %c0_7 = arith.constant 0 : index
      %16 = vector.load %arg5[%c0_6, %c0_7] : memref<128x128xbf16, #tpu.memory_space<vmem>>, vector<128x128xbf16>
      %cst = arith.constant dense<0.000000e+00> : vector<256x128xf32>
      %17 = tpu.matmul %15, %16, %cst {dimension_numbers = #tpu.dot_dimension_numbers<[1], [0], [0], [1], [0, 0, 1, 1], [], []>} : vector<256x128xbf16>, vector<128x128xbf16>, vector<256x128xf32> -> vector<256x128xf32>
      %c0_8 = arith.constant 0 : index
      %c0_9 = arith.constant 0 : index
      %18 = vector.load %arg6[%c0_8, %c0_9] : memref<1x128xf32, #tpu.memory_space<vmem>>, vector<1x128xf32>
      %19 = vector.broadcast %18 : vector<1x128xf32> to vector<256x128xf32>
      %20 = arith.addf %17, %19 : vector<256x128xf32>
      %21 = math.tanh %20 : vector<256x128xf32>
      %22 = arith.truncf %21 : vector<256x128xf32> to vector<256x128xbf16>
      %23 = arith.extf %22 : vector<256x128xbf16> to vector<256x128xf32>
      %24 = vector.shape_cast %23 : vector<256x128xf32> to vector<2x128x128xf32>
      %c128_i32_10 = arith.constant 128 : i32
      %25 = arith.muli %arg2, %c128_i32_10 : i32
      %26 = tpu.iota {dimensions = array<i32: 1>} : vector<2x128x1xi32>
      %27 = vector.broadcast %25 : i32 to vector<2x128x1xi32>
      %28 = arith.addi %27, %26 : vector<2x128x1xi32>
      %c0_11 = arith.constant 0 : index
      %c0_12 = arith.constant 0 : index
      %c0_13 = arith.constant 0 : index
      %29 = vector.load %arg7[%c0_11, %c0_12, %c0_13] : memref<2x1x1xi32, #tpu.memory_space<vmem>>, vector<2x1x1xi32>
      %30 = vector.broadcast %29 : vector<2x1x1xi32> to vector<2x128x1xi32>
      %31 = arith.cmpi sge, %28, %30 : vector<2x128x1xi32>
      %32 = arith.extui %31 : vector<2x128x1xi1> to vector<2x128x1xi32>
      %33 = arith.sitofp %32 : vector<2x128x1xi32> to vector<2x128x1xf32>
      %c0_14 = arith.constant 0 : index
      %c0_15 = arith.constant 0 : index
      %c0_16 = arith.constant 0 : index
      %34 = vector.load %arg9[%c0_14, %c0_15, %c0_16] : memref<2x1x128xf32, #tpu.memory_space<vmem>>, vector<2x1x128xf32>
      %35 = vector.broadcast %33 : vector<2x128x1xf32> to vector<2x128x128xf32>
      %36 = arith.mulf %24, %35 : vector<2x128x128xf32>
      %cst_17 = arith.constant dense<0.000000e+00> : vector<2x128xf32>
      %37 = vector.multi_reduction <add>, %36, %cst_17 [1] : vector<2x128x128xf32> to vector<2x128xf32>
      %38 = vector.shape_cast %37 : vector<2x128xf32> to vector<2x1x128xf32>
      %39 = arith.addf %34, %38 : vector<2x1x128xf32>
      %c0_18 = arith.constant 0 : index
      %c0_19 = arith.constant 0 : index
      %c0_20 = arith.constant 0 : index
      %40 = vector.load %arg9[%c0_18, %c0_19, %c0_20] : memref<2x1x128xf32, #tpu.memory_space<vmem>>, vector<2x1x128xf32>
      tpu.vector_store %arg9[%c0_18, %c0_19, %c0_20], %39 {strides = array<i32>} : memref<2x1x128xf32, #tpu.memory_space<vmem>>, vector<2x1x128xf32>,
    } else {
    }
    %c1_i32_2 = arith.constant 1 : i32
    %11 = arith.cmpi eq, %arg2, %c1_i32_2 : i32
    %12 = arith.extui %11 : i1 to i32
    %c0_i32_3 = arith.constant 0 : i32
    %13 = arith.cmpi ne, %12, %c0_i32_3 : i32
    scf.if %13 {
      %c0 = arith.constant 0 : index
      %c0_4 = arith.constant 0 : index
      %c0_5 = arith.constant 0 : index
      %14 = vector.load %arg9[%c0, %c0_4, %c0_5] : memref<2x1x128xf32, #tpu.memory_space<vmem>>, vector<2x1x128xf32>
      %c0_6 = arith.constant 0 : index
      %c0_7 = arith.constant 0 : index
      %c0_8 = arith.constant 0 : index
      %15 = vector.load %arg8[%c0_6, %c0_7, %c0_8] : memref<2x1x1xf32, #tpu.memory_space<vmem>>, vector<2x1x1xf32>
      %16 = vector.broadcast %15 : vector<2x1x1xf32> to vector<2x1x128xf32>
      %17 = arith.mulf %14, %16 : vector<2x1x128xf32>
      %c0_9 = arith.constant 0 : index
      %c0_10 = arith.constant 0 : index
      %c0_11 = arith.constant 0 : index
      %18 = vector.load %arg9[%c0_9, %c0_10, %c0_11] : memref<2x1x128xf32, #tpu.memory_space<vmem>>, vector<2x1x128xf32>
      tpu.vector_store %arg9[%c0_9, %c0_10, %c0_11], %17 {strides = array<i32>} : memref<2x1x128xf32, #tpu.memory_space<vmem>>, vector<2x1x128xf32>,
    } else {
    }
    return
  }
  func.func @transform_0(%arg0: i32, %arg1: i32, %arg2: i32, %arg3: memref<1xi32, #tpu.memory_space<smem>>) -> (i32, i32, i32) {
    %c0_i32 = arith.constant 0 : i32
    %c0_i32_0 = arith.constant 0 : i32
    return %arg0, %arg2, %c0_i32 : i32, i32, i32
  }
  func.func @transform_1(%arg0: i32, %arg1: i32, %arg2: i32, %arg3: memref<1xi32, #tpu.memory_space<smem>>) -> (i32, i32) {
    %c0_i32 = arith.constant 0 : i32
    %c0_i32_0 = arith.constant 0 : i32
    return %c0_i32, %arg1 : i32, i32
  }
  func.func @transform_2(%arg0: i32, %arg1: i32, %arg2: i32, %arg3: memref<1xi32, #tpu.memory_space<smem>>) -> (i32, i32) {
    %c0_i32 = arith.constant 0 : i32
    %c0_i32_0 = arith.constant 0 : i32
    return %c0_i32, %arg1 : i32, i32
  }
  func.func @transform_3(%arg0: i32, %arg1: i32, %arg2: i32, %arg3: memref<1xi32, #tpu.memory_space<smem>>) -> (i32, i32, i32) {
    %c0_i32 = arith.constant 0 : i32
    %c0_i32_0 = arith.constant 0 : i32
    %c0_i32_1 = arith.constant 0 : i32
    return %arg0, %c0_i32, %c0_i32_0 : i32, i32, i32
  }
  func.func @transform_4(%arg0: i32, %arg1: i32, %arg2: i32, %arg3: memref<1xi32, #tpu.memory_space<smem>>) -> (i32, i32, i32) {
    %c0_i32 = arith.constant 0 : i32
    %c0_i32_0 = arith.constant 0 : i32
    %c0_i32_1 = arith.constant 0 : i32
    return %arg0, %c0_i32, %c0_i32_0 : i32, i32, i32
  }
  func.func @transform_5(%arg0: i32, %arg1: i32, %arg2: i32, %arg3: memref<1xi32, #tpu.memory_space<smem>>) -> (i32, i32, i32) {
    %c0_i32 = arith.constant 0 : i32
    %c0_i32_0 = arith.constant 0 : i32
    return %arg0, %c0_i32, %arg1 : i32, i32, i32
  }
}

</mosaic_0001>

<bundles_post_ra>
// kernel: tpu_custom_call.1
= control target key start
LH: loop header
LB: loop body
LE: loop exit
PB: predicated region body
PF: predicated region fallthrough
CT: control target
= control target key end

     0   :  { %s2401_s0 = inlined_call_operand.<no memory space> [shape: s32[1], index: 0, kind: input, shape index: {}]   ;;  %s2402_s1 = inlined_call_operand.hbm [shape: bf16[2,256,128], index: 1, kind: input, shape index: {}]   ;;  %s2403_s2 = inlined_call_operand.hbm [shape: bf16[128,128], index: 2, kind: input, shape index: {}]   ;;  %s2404_s3 = inlined_call_operand.vmem [shape: f32[1,128], index: 3, kind: input, shape index: {}]   ;;  %s2405_s4 = inlined_call_operand.vmem [shape: s32[2,1,1], index: 4, kind: input, shape index: {}]   ;;  %s2406_s5 = inlined_call_operand.vmem [shape: f32[2,1,1], index: 5, kind: input, shape index: {}]   ;;  %s2407_s6 = inlined_call_operand.hbm [shape: f32[2,1,128], index: 6, kind: output, shape index: {}]  }
   0x1   :  { %11 = sst [smem:[#allocation3]] %s2401_s0 }
   0x2   :  { %12 = vsyncpa [#allocation5], 0 }
   0x3   :  { %14 = vsyncpa [#allocation5 + $0x1], 0 }
   0x4   :  { %15 = vsyncpa [#allocation8], 0 }
   0x5   :  { %16 = vsyncpa [#allocation6], 0  ;;  %s1964_s23 = smov 0   ;;  %s1966_s24 = smov 0  }
   0x6   :  { %s1968_s25 = smov 0   ;;  %s1970_s26 = smov 0  }
   0x7   :  { %s1972_s27 = smov 0   ;;  %s1974_s28 = smov 0  }
   0x8 LB: > { %s2413_s0 = sadd.s32 4294967295, %s1908_s28   ;;  %s34_s29 = sadd.s32 1, %s1904_s27  ;;  %s1908_s28 = sphi %s1974_s28, %s22_s28   ;;  %s1904_s27 = sphi %s1972_s27, %s2429_s27   ;;  %s1900_s26 = sphi %s1970_s26, %s2428_s26   ;;  %s1896_s25 = sphi %s1968_s25, %s2427_s25   ;;  %s1892_s24 = sphi %s1966_s24, %s2426_s24   ;;  %s1888_s23 = sphi %s1964_s23, %s2425_s23  }
   0x9   : > { %p35_p0 = scmp.ge.s32.totalorder %s34_s29, 2  ;;  %s50_s30 = sadd.s32 1, %s1896_s25 }
   0xa   : > { %p57_p1 = scmp.ne.s32.totalorder %s1896_s25, %s1892_s24  ;;  %p58_p2 = scmp.eq.s32.totalorder %s1908_s28, 0 }
   0xb   : > { %s2431_s29 = smov (%p35_p0, %s34_s29), 0  ;;  %p63_p4 = scmp.ne.s32.totalorder %s1892_s24, %s1888_s23 }
   0xc   : > { %p2000_p3 = por %p58_p2, %p57_p1  ;;  %s46_s8 = ssub.s32 %s1904_s27, %s2431_s29 }
   0xd   : > { %p2009_p5 = scmp.eq.s32.totalorder %s2413_s0, 0  ;;  %p48_p6 = scmp.eq.s32.totalorder %s46_s8, 0 }
   0xe   : > { %s2414_s7 = scalar_select %p2000_p3, 1, 0 }
   0xf   : > { %s2415_s9 = scalar_select %p2009_p5, 1, 0 }
  0x10   : > { %p1363_p7 = scmp.ge.s32.totalorder %s1908_s28, 1  ;;  %p2016_p8 = por %p2009_p5, %p63_p4 }
  0x11   : > { %p206_p9 = scmp.lt.s32.totalorder %s1908_s28, 3  ;;  %s1910_s13 = smov [#allocation7]  }
  0x12   : > { %s2416_s10 = scalar_select %p2016_p8, 1, 0 }
  0x13   : > { %s2022_s11 = scalar_select %p48_p6, %s1896_s25, %s50_s30  }
  0x14   : > { %p2024_p10 = pnand %p1363_p7, %p206_p9  ;;  %s220_s14 = sshll.u32 %s1910_s13, 4  ;;  %s221_s14 = int_to_ptr.vmem [resolvable:$true] %s220_s14 }
  0x15   : > { %s1796_s18 = scalar_lea.hbm %s2403_s2, 1024 }
  0x16   : > { %s2417_s12 = scalar_select %p2024_p10, 1, 0 }
  0x17   : > { %p1553_p11 = pneg %p2024_p10  ;;  %p1797_p13 = scmp.ne.s32.totalorder %s2403_s2, %s1796_s18 }
  0x18   : > { %p1803_p4 = scmp.lt.u32.totalorder %s1796_s18, %s2403_s2 }
  0x19   : > { %p2032_p12 = pnand %p1553_p11, %p2009_p5 }
  0x1b   : > { %p1798_p0 = pneg %p2032_p12 }
  0x1d   : > { %p1799_p1 = pnand %p1798_p0, %p1797_p13 }
  0x1f   : > { %p1800_p2 = pneg %p1799_p1 }
  0x21   : > { %p1805_p6 = pnand %p1803_p4, %p1800_p2 }
  0x23   : > { %1808 = shalt.err (!%p1805_p6)
}
  0x24   : > { %s1809_s23 = scalar_lea.vmem %s221_s14, 1024  ;;  %p1817_p5 = scmp.lt.s32.totalorder %s221_s14, %s221_s14 }
  0x25   : > { %p1810_p7 = scmp.ne.s32.totalorder %s221_s14, %s1809_s23  ;;  %p1818_p8 = scmp.lt.s32.totalorder %s1809_s23, %s1809_s23 }
  0x27   : > { %p1812_p9 = pnand %p1810_p7, %p1798_p0  ;;  %p1819_p10 = por %p1818_p8, %p1817_p5 }
  0x29   : > { %p1813_p11 = pneg %p1812_p9 }
  0x2b   : > { %p1820_p3 = pnand %p1819_p10, %p1813_p11 }
  0x2d   : > { %1823 = shalt.err (!%p1820_p3)
}
  0x2e   : > { %s1911_s30 = smov 64   ;;  %s1912_s8 = smov 4  }
  0x2f   : > { %1556 = dma.hbm_to_vmem [thread:$0]  (!%p2032_p12), %s2403_s2, 1024, %s221_s14, [#allocation8], %s1911_s30, %s1911_s30, %s1912_s8  }
  0x30   : > { %p1368_p13 = scmp.ge.s32.totalorder %s1908_s28, 2 }
  0x32   : > { %252 = sbr.rel (%p1368_p13) target bundleno = 72 (0x48), region = 32 }
  0x39   : > { %s256_s17 = sand.u32 1, %s1896_s25   ;;  %s1445_s18 = sshll.u32 %s1904_s27, 10 }
  0x3a   : > { %s1369_s19 = sshll.u32 %s256_s17, 7  ;;  %s269_s21 = scalar_lea.hbm %s2402_s1, %s1445_s18 }
  0x3b   : > { %p2419_p3 = scmp.ne.s32.totalorder %s2414_s7, 0  ;;  %s260_s22 = scalar_lea.vmem [#allocation4], %s1369_s19 }
  0x3c   : > { %s282_s23 = sshll.u32 %s260_s22, 4  ;;  %s1913_s8 = smov 2048   ;;  %s283_s23 = int_to_ptr.vmem [resolvable:$true] %s282_s23 }
  0x3d   : > { %s1538_s14 = scalar_select %p2419_p3, [#allocation0], [#allocation12] }
  0x3e   : > { %1539 = sst [smem:[#allocation11]] (%p2419_p3), %s1913_s8  ;;  %s1914_s13 = smov 1024  }
  0x3f   : > { %s274_s30 = sld [smem:[%s1538_s14]]   ;;  %s1915_s16 = smov 16  }
  0x40   : > { %1540 = sst [smem:[#allocation11 + $0x1]] (%p2419_p3), %s1914_s13  ;;  %s1916_s0 = smov 64  }
  0x41   : > { %1541 = sst [smem:[#allocation11 + $0x2]] (%p2419_p3), %s1915_s16  ;;  %s1917_s19 = smov 4  }
  0x42   : > { %1542 = sst [smem:[#allocation11 + $0x3]] (%p2419_p3), %s1916_s0  ;;  %s257_s15 = scalar_lea.sflag [#allocation5], %s256_s17 }
  0x43   : > { %1543 = sst [smem:[#allocation11 + $0x4]] (%p2419_p3), %s1916_s0  ;;  %s1918_s14 = smov [#allocation10]  }
  0x44   : > { %1544 = sst [smem:[#allocation11 + $0x5]] (%p2419_p3), %s1917_s19 }
  0x45   : > { %s1372_s18 = sshll.u32 %s274_s30, 26 }
  0x46   : > { %s1373_s20 = sadd.s32 134217728, %s1372_s18 }
  0x47   : > { %1545 = dma.general (%p2419_p3), %s269_s21, 2048, %s283_s23, %s257_s15, %s1918_s14, [#allocation11], %s1373_s20, 0  }
  0x48 PF: > { %p2420_p5 = scmp.ne.s32.totalorder %s2417_s12, 0 }
  0x49   : > { %s309_s22 = sand.u32 (!%p2420_p5), 1, %s1892_s24   ;;  %p2421_p8 = scmp.ne.s32.totalorder (!%p2420_p5), %s2416_s10, 0 }
  0x4a   : > { %307 = sbr.rel (%p2420_p5) target bundleno = 596 (0x254), region = 40  ;;  %s1375_s8 = sshll.u32 (!%p2420_p5), %s309_s22, 7 }
  0x4b   : > { %s310_s13 = scalar_lea.sflag (!%p2420_p5), [#allocation5], %s309_s22  ;;  %s2077_s16 = scalar_lea.vmem (!%p2420_p5), [#allocation4], %s1375_s8 }
  0x51   : > { %1875 = dma.done.wait (%p2421_p8), %s310_s13, 2048  }
  0x52   : > { %1877 = vsyncadd (%p2421_p8), %s310_s13, 4294965248  ;;  %p2422_p10 = scmp.ne.s32.totalorder %s2415_s9, 0 }
  0x54   : > { %1879 = dma.done.wait (%p2422_p10), [#allocation8], 1024  }
  0x55   : > { %1881 = vsyncadd (%p2422_p10), [#allocation8], 4294966272  ;;  %p1377_p12 = scmp.ne.s32.totalorder %s1900_s26, 0 }
  0x56   : > { %v1919_v0 = vmov (!%p1377_p12), 0.0  }
  0x57   : > { %370 = sbr.rel (%p1377_p12) target bundleno = 94 (0x5e), region = 52  ;;  %371 = vst [vmem:[#allocation9] sm:$0x1] (!%p1377_p12), %v1919_v0  ;;  %372 = vst [vmem:[#allocation9 + $0x1] sm:$0x1] (!%p1377_p12), %v1919_v0 }
  0x5e PF: > { %s1446_s0 = sshll.u32 %s1900_s26, 7  ;;  %s375_s7 = sld [smem:[#allocation3]] }
  0x5f   : > { %s1447_s10 = sadd.s32 128, %s1446_s0 }
  0x64   : > { %s376_s12 = ssub.s32 256, %s375_s7 }
  0x65   : > { %p1379_p0 = scmp.le.s32.totalorder %s1447_s10, %s376_s12 }
  0x66   : > { %v1707_v1 = vld [vmem:[#allocation7] sm:$0xff] (!%p1379_p0)   ;;  %v1708_v2 = vld [vmem:[#allocation7 + $0x8] sm:$0xff] (!%p1379_p0)   ;;  %v1920_v3 = vmov (!%p1379_p0), 0   ;;  %v1709_v4 = vld [vmem:[#allocation7 + $0x10] sm:$0xff] (!%p1379_p0)   ;;  %v822_v6 = vlaneseq (!%p1379_p0)  ;;  %v2101_v17 = vstv (!%p1379_p0), %s1446_s0  ;;  %v1921_v39 = vmov (!%p1379_p0), 0.0  }
  0x67   : > { %380 = sbr.rel (%p1379_p0) target bundleno = 430 (0x1ae), region = 56  ;;  %1636 = vset.pattern.permute.xlu1 (!%p1379_p0), %v1920_v3  ;;  %1625 = vset.pattern.permute.xlu0 (!%p1379_p0), %v1920_v3  ;;  %v1710_v5 = vld [vmem:[#allocation7 + $0x18] sm:$0xff] (!%p1379_p0)   ;;  %v1715_v7 = vld [vmem:[%s2077_s16] sm:$0xff] (!%p1379_p0)   ;;  %v1712_v12 = vld [vmem:[#allocation7 + $0x28] sm:$0xff] (!%p1379_p0)  }
  0x68   : > { %1472 = vmatprep.subr.bf16.mxu0 (!%p1379_p0), %v1707_v1  ;;  %1520 = vmatprep.subr.bf16.mxu1 (!%p1379_p0), %v1707_v1  ;;  %v1716_v8 = vld [vmem:[%s2077_s16 + $0x40] sm:$0xff] (!%p1379_p0)   ;;  %v2093_v9 = vshrl.u32 (!%p1379_p0), %v822_v6, 7  ;;  %v1713_v16 = vld [vmem:[#allocation7 + $0x30] sm:$0xff] (!%p1379_p0)   ;;  %v1714_v32 = vld [vmem:[#allocation7 + $0x38] sm:$0xff] (!%p1379_p0)  }
  0x69   : > { %1473 = vmatpush3.bf16.msra.mxu0 (!%p1379_p0), %v1707_v1  ;;  %1528 = vmatpush3.bf16.msra.mxu1 (!%p1379_p0), %v1707_v1  ;;  %v1711_v10 = vld [vmem:[#allocation7 + $0x20] sm:$0xff] (!%p1379_p0)   ;;  %v1717_v51 = vld [vmem:[%s2077_s16 + $0x8] sm:$0xff] (!%p1379_p0)   ;;  %v1719_v56 = vld [vmem:[%s2077_s16 + $0x10] sm:$0xff] (!%p1379_p0)  }
  0x6a   : > { %1474 = vmatprep.subr.bf16.mxu0 (!%p1379_p0), %v1708_v2  ;;  %1521 = vmatprep.subr.bf16.mxu1 (!%p1379_p0), %v1708_v2  ;;  %v827_v11 = vadd.s32 (!%p1379_p0), 32, %v2093_v9  ;;  %v824_v13 = vadd.s32 (!%p1379_p0), 8, %v2093_v9  ;;  %v825_v14 = vadd.s32 (!%p1379_p0), 16, %v2093_v9  ;;  %v826_v15 = vadd.s32 (!%p1379_p0), 24, %v2093_v9  ;;  %v2125_v33 = vld [vmem:[%s2405_s4] ss:$0 sm:$0xff] (!%p1379_p0) }
  0x6b   : > { %1488 = vmatprep.mubr.bf16.mxu0 (!%p1379_p0), %v1715_v7  ;;  %1504 = vmatprep.mubr.bf16.mxu1 (!%p1379_p0), %v1716_v8  ;;  %v828_v18 = vadd.s32 (!%p1379_p0), 40, %v2093_v9  ;;  %v830_v19 = vadd.s32 (!%p1379_p0), 56, %v2093_v9  ;;  %v829_v20 = vadd.s32 (!%p1379_p0), 48, %v2093_v9  ;;  %v832_v21 = vadd.s32 (!%p1379_p0), 72, %v2093_v9  ;;  %v2130_v34 = vld [vmem:[%s2405_s4 + $0x1] ss:$0 sm:$0xff] (!%p1379_p0) }
  0x6c   : > { %v831_v22 = vadd.s32 (!%p1379_p0), 64, %v2093_v9  ;;  %v834_v23 = vadd.s32 (!%p1379_p0), 88, %v2093_v9  ;;  %v840_v24 = vadd.s32 (!%p1379_p0), %v2101_v17, %v2093_v9  ;;  %v844_v25 = vadd.s32 (!%p1379_p0), %v2101_v17, %v827_v11  ;;  %v1718_v52 = vld [vmem:[%s2077_s16 + $0x48] sm:$0xff] (!%p1379_p0)   ;;  %v1720_v57 = vld [vmem:[%s2077_s16 + $0x50] sm:$0xff] (!%p1379_p0)  }
  0x6d   : > { %1475 = vmatpush3.bf16.msra.mxu0 (!%p1379_p0), %v1708_v2  ;;  %1529 = vmatpush3.bf16.msra.mxu1 (!%p1379_p0), %v1708_v2  ;;  %v841_v26 = vadd.s32 (!%p1379_p0), %v2101_v17, %v824_v13  ;;  %v842_v27 = vadd.s32 (!%p1379_p0), %v2101_v17, %v825_v14  ;;  %v843_v28 = vadd.s32 (!%p1379_p0), %v2101_v17, %v826_v15  ;;  %v833_v38 = vadd.s32 (!%p1379_p0), 80, %v2093_v9  ;;  %v1722_v13 = vld [vmem:[%s2077_s16 + $0x58] sm:$0xff] (!%p1379_p0)  }
  0x6e   : > { %1476 = vmatprep.subr.bf16.mxu0 %v1709_v4  ;;  %1522 = vmatprep.subr.bf16.mxu1 %v1709_v4  ;;  %v845_v29 = vadd.s32 %v2101_v17, %v828_v18  ;;  %v2117_v30 = vadd.s32 %v2101_v17, %v830_v19  ;;  %v2120_v31 = vadd.s32 %v2101_v17, %v829_v20  ;;  %v836_v46 = vadd.s32 104, %v2093_v9  ;;  %v1723_v18 = vld [vmem:[%s2077_s16 + $0x20] sm:$0xff]  }
  0x6f   : > { %v2133_v35 = vadd.s32 %v2101_v17, %v832_v21  ;;  %v2136_v36 = vadd.s32 %v2101_v17, %v831_v22  ;;  %v2139_v37 = vadd.s32 %v2101_v17, %v834_v23  ;;  %vm870_vm0 = vcmp.ge.s32.totalorder %v844_v25, %v2125_v33  ;;  %v1724_v19 = vld [vmem:[%s2077_s16 + $0x60] sm:$0xff]  }
  0x70   : > { %vm882_vm1 = vcmp.ge.s32.totalorder %v840_v24, %v2130_v34  ;;  %vm866_vm2 = vcmp.ge.s32.totalorder %v840_v24, %v2125_v33  ;;  %vm867_vm3 = vcmp.ge.s32.totalorder %v841_v26, %v2125_v33  ;;  %v1412_v40 = vsel %vm870_vm0, 1.0, %v1921_v39 }
  0x71   : > { %1477 = vmatpush3.bf16.msra.mxu0 %v1709_v4  ;;  %1530 = vmatpush3.bf16.msra.mxu1 %v1709_v4  ;;  %v1424_v41 = vsel %vm882_vm1, 1.0, %v1921_v39  ;;  %v1408_v42 = vsel %vm866_vm2, 1.0, %v1921_v39  ;;  %v1409_v43 = vsel %vm867_vm3, 1.0, %v1921_v39  ;;  %vm883_vm4 = vcmp.ge.s32.totalorder %v841_v26, %v2130_v34 }
  0x72   : > { %1478 = vmatprep.subr.bf16.mxu0 %v1710_v5  ;;  %1523 = vmatprep.subr.bf16.mxu1 %v1710_v5  ;;  %v1637_v44 = vpack.i.bf16 %v1424_v41, %v1412_v40  ;;  %v1626_v45 = vpack.i.bf16 %v1409_v43, %v1408_v42  ;;  %vm884_vm5 = vcmp.ge.s32.totalorder %v842_v27, %v2130_v34  ;;  %v1425_v47 = vsel %vm883_vm4, 1.0, %v1921_v39 }
  0x73   : > { %vm868_vm6 = vcmp.ge.s32.totalorder %v842_v27, %v2125_v33  ;;  %vm869_vm7 = vcmp.ge.s32.totalorder %v843_v28, %v2125_v33  ;;  %v1426_v48 = vsel %vm884_vm5, 1.0, %v1921_v39  ;;  %vm871_vm8 = vcmp.ge.s32.totalorder %v845_v29, %v2125_v33 }
  0x74   : > { %1638 = vperm.xlu1 %1636, %v1637_v44   ;;  %1627 = vperm.xlu0 %1625, %v1626_v45   ;;  %v1410_v49 = vsel %vm868_vm6, 1.0, %v1921_v39  ;;  %v1411_v50 = vsel %vm869_vm7, 1.0, %v1921_v39  ;;  %v1642_v53 = vpack.i.bf16 %v1426_v48, %v1425_v47  ;;  %vm887_vm9 = vcmp.ge.s32.totalorder %v845_v29, %v2130_v34  ;;  %v1725_v29 = vld [vmem:[%s2077_s16 + $0x28] sm:$0xff]   ;;  %v1730_v47 = vld [vmem:[%s2077_s16 + $0x78] sm:$0xff]  }
  0x75   : > { %1479 = vmatpush3.bf16.msra.mxu0 %v1710_v5  ;;  %1531 = vmatpush3.bf16.msra.mxu1 %v1710_v5  ;;  %v1631_v54 = vpack.i.bf16 %v1411_v50, %v1410_v49  ;;  %v1413_v55 = vsel %vm871_vm8, 1.0, %v1921_v39  ;;  %v1429_v58 = vsel %vm887_vm9, 1.0, %v1921_v39  ;;  %vm885_vm10 = vcmp.ge.s32.totalorder %v843_v28, %v2130_v34 }
  0x76   : > { %1480 = vmatprep.subr.bf16.mxu0 %v1711_v10  ;;  %1524 = vmatprep.subr.bf16.mxu1 %v1711_v10  ;;  %vm886_vm11 = vcmp.ge.s32.totalorder %v844_v25, %v2130_v34  ;;  %vm873_vm12 = vcmp.ge.s32.totalorder %v2117_v30, %v2125_v33  ;;  %v1427_v59 = vsel %vm885_vm10, 1.0, %v1921_v39  ;;  %vm889_vm13 = vcmp.ge.s32.totalorder %v2117_v30, %v2130_v34  ;;  %v1726_v30 = vld [vmem:[%s2077_s16 + $0x68] sm:$0xff]  }
  0x77   : > { %v1428_v60 = vsel %vm886_vm11, 1.0, %v1921_v39  ;;  %v850_v61 = vadd.s32 %v2101_v17, %v833_v38  ;;  %v1652_v62 = vpack.i.bf16 %v1429_v58, %v1413_v55  ;;  %v1415_v0 = vsel %vm873_vm12, 1.0, %v1921_v39  ;;  %v1728_v38 = vld [vmem:[%s2077_s16 + $0x70] sm:$0xff]  }
  0x78   : > { %1643 = vperm.xlu1 %1636, %v1642_v53   ;;  %1632 = vperm.xlu0 %1625, %v1631_v54   ;;  %v1647_v63 = vpack.i.bf16 %v1428_v60, %v1427_v59  ;;  %vm872_vm14 = vcmp.ge.s32.totalorder %v2120_v31, %v2125_v33  ;;  %v1431_v1 = vsel %vm889_vm13, 1.0, %v1921_v39  ;;  %vm888_vm15 = vcmp.ge.s32.totalorder %v2120_v31, %v2130_v34 }
  0x79   : > { %1481 = vmatpush3.bf16.msra.mxu0 %v1711_v10  ;;  %1532 = vmatpush3.bf16.msra.mxu1 %v1711_v10  ;;  %v1414_v2 = vsel %vm872_vm14, 1.0, %v1921_v39  ;;  %vm875_vm0 = vcmp.ge.s32.totalorder %v2133_v35, %v2125_v33  ;;  %v1430_v3 = vsel %vm888_vm15, 1.0, %v1921_v39  ;;  %vm891_vm1 = vcmp.ge.s32.totalorder %v2133_v35, %v2130_v34 }
  0x7a   : > { %1482 = vmatprep.subr.bf16.mxu0 %v1712_v12  ;;  %1525 = vmatprep.subr.bf16.mxu1 %v1712_v12  ;;  %vm874_vm2 = vcmp.ge.s32.totalorder %v2136_v36, %v2125_v33  ;;  %v835_v4 = vadd.s32 96, %v2093_v9  ;;  %vm890_vm3 = vcmp.ge.s32.totalorder %v2136_v36, %v2130_v34  ;;  %v853_v5 = vadd.s32 %v2101_v17, %v836_v46  ;;  %v1729_v46 = vld [vmem:[%s2077_s16 + $0x38] sm:$0xff]  }
  0x7b   : > { %v838_v6 = vadd.s32 120, %v2093_v9  ;;  %v1662_v7 = vpack.i.bf16 %v1431_v1, %v1415_v0  ;;  %v1657_v8 = vpack.i.bf16 %v1430_v3, %v1414_v2  ;;  %v1417_v10 = vsel %vm875_vm0, 1.0, %v1921_v39 }
  0x7c   : > { %1653 = vperm.xlu1 %1636, %v1652_v62   ;;  %1648 = vperm.xlu0 %1625, %v1647_v63   ;;  %v837_v11 = vadd.s32 112, %v2093_v9  ;;  %v1433_v14 = vsel %vm891_vm1, 1.0, %v1921_v39  ;;  %v1416_v15 = vsel %vm874_vm2, 1.0, %v1921_v39  ;;  %vm877_vm4 = vcmp.ge.s32.totalorder %v2139_v37, %v2125_v33 }
  0x7d   : > { %1483 = vmatpush3.bf16.msra.mxu0 %v1712_v12  ;;  %1533 = vmatpush3.bf16.msra.mxu1 %v1712_v12  ;;  %v1721_v12 = vld [vmem:[%s2077_s16 + $0x18] sm:$0xff]   ;;  %vm893_vm5 = vcmp.ge.s32.totalorder %v2139_v37, %v2130_v34  ;;  %vm876_vm6 = vcmp.ge.s32.totalorder %v850_v61, %v2125_v33  ;;  %vm892_vm7 = vcmp.ge.s32.totalorder %v850_v61, %v2130_v34  ;;  %v1419_v23 = vsel %vm877_vm4, 1.0, %v1921_v39  ;;  %v1727_v37 = vld [vmem:[%s2077_s16 + $0x30] sm:$0xff]  }
  0x7e   : > { %1484 = vmatprep.subr.bf16.mxu0 %v1713_v16  ;;  %1526 = vmatprep.subr.bf16.mxu1 %v1713_v16  ;;  %v852_v9 = vadd.s32 %v2101_v17, %v835_v4  ;;  %v855_v20 = vadd.s32 %v2101_v17, %v838_v6  ;;  %v1672_v21 = vpack.i.bf16 %v1433_v14, %v1417_v10  ;;  %v1435_v25 = vsel %vm893_vm5, 1.0, %v1921_v39 }
  0x7f   : > { %v854_v24 = vadd.s32 %v2101_v17, %v837_v11  ;;  %v1418_v26 = vsel %vm876_vm6, 1.0, %v1921_v39  ;;  %v1434_v27 = vsel %vm892_vm7, 1.0, %v1921_v39  ;;  %vm879_vm8 = vcmp.ge.s32.totalorder %v853_v5, %v2125_v33 }
  0x80   : > { %1663 = vperm.xlu1 %1636, %v1662_v7   ;;  %1658 = vperm.xlu0 %1625, %v1657_v8   ;;  %vm895_vm9 = vcmp.ge.s32.totalorder %v853_v5, %v2130_v34  ;;  %vm878_vm10 = vcmp.ge.s32.totalorder %v852_v9, %v2125_v33  ;;  %vm894_vm11 = vcmp.ge.s32.totalorder %v852_v9, %v2130_v34  ;;  %v1421_v31 = vsel %vm879_vm8, 1.0, %v1921_v39 }
  0x81   : > { %1485 = vmatpush3.bf16.msra.mxu0 %v1713_v16  ;;  %1534 = vmatpush3.bf16.msra.mxu1 %v1713_v16  ;;  %v1432_v16 = vsel %vm890_vm3, 1.0, %v1921_v39  ;;  %v1682_v17 = vpack.i.bf16 %v1435_v25, %v1419_v23  ;;  %v1677_v28 = vpack.i.bf16 %v1434_v27, %v1418_v26  ;;  %v1420_v35 = vsel %vm878_vm10, 1.0, %v1921_v39 }
  0x82   : > { %1486 = vmatprep.subr.bf16.mxu0 %v1714_v32  ;;  %1527 = vmatprep.subr.bf16.mxu1 %v1714_v32  ;;  %v1667_v22 = vpack.i.bf16 %v1432_v16, %v1416_v15  ;;  %v1436_v36 = vsel %vm894_vm11, 1.0, %v1921_v39  ;;  %vm881_vm12 = vcmp.ge.s32.totalorder %v855_v20, %v2125_v33  ;;  %vm897_vm13 = vcmp.ge.s32.totalorder %v855_v20, %v2130_v34 }
  0x83   : > { %vm880_vm14 = vcmp.ge.s32.totalorder %v854_v24, %v2125_v33  ;;  %vm896_vm15 = vcmp.ge.s32.totalorder %v854_v24, %v2130_v34  ;;  %v1687_v41 = vpack.i.bf16 %v1436_v36, %v1420_v35  ;;  %v1423_v42 = vsel %vm881_vm12, 1.0, %v1921_v39 }
  0x84   : > { %1673 = vperm.xlu1 %1636, %v1672_v21   ;;  %1668 = vperm.xlu0 %1625, %v1667_v22   ;;  %v1439_v43 = vsel %vm897_vm13, 1.0, %v1921_v39  ;;  %v1422_v44 = vsel %vm880_vm14, 1.0, %v1921_v39  ;;  %v1438_v45 = vsel %vm896_vm15, 1.0, %v1921_v39 }
  0x85   : > { %1487 = vmatpush3.bf16.msra.mxu0 %v1714_v32  ;;  %1535 = vmatpush3.bf16.msra.mxu1 %v1714_v32  ;;  %v1437_v32 = vsel %vm895_vm9, 1.0, %v1921_v39  ;;  %v1702_v33 = vpack.i.bf16 %v1439_v43, %v1423_v42  ;;  %v1697_v34 = vpack.i.bf16 %v1438_v45, %v1422_v44  ;;  %v2246_v39 = vld [vmem:[%s2404_s3] ss:$0 sm:$0xff] }
  0x86   : > { %v1692_v40 = vpack.i.bf16 %v1437_v32, %v1421_v31 }
  0x88   : > { %1489 = vmatmul.mubr.bf16.vlgmr.msra.gmra.mrb[0].mxu0 %v1717_v51  ;;  %1505 = vmatmul.mubr.bf16.vlgmr.msra.gmra.mrb[0].mxu1 %v1718_v52 }
  0x89   : > { %1492 = vmatprep.mubr.bf16.mxu0 %v1719_v56  ;;  %1508 = vmatprep.mubr.bf16.mxu1 %v1720_v57 }
  0x8a   : > { %1683 = vperm.xlu1 %1636, %v1682_v17   ;;  %1678 = vperm.xlu0 %1625, %v1677_v28  }
  0x8e   : > { %1693 = vperm.xlu1 %1636, %v1692_v40   ;;  %1688 = vperm.xlu0 %1625, %v1687_v41  }
  0x90   : > { %1493 = vmatmul.mubr.bf16.gmra.mrb[4].mxu0 %v1721_v12  ;;  %1509 = vmatmul.mubr.bf16.gmra.mrb[4].mxu1 %v1722_v13 }
  0x91   : > { %1496 = vmatprep.mubr.bf16.mxu0 %v1723_v18  ;;  %1512 = vmatprep.mubr.bf16.mxu1 %v1724_v19 }
  0x92   : > { %1703 = vperm.xlu1 %1636, %v1702_v33   ;;  %1698 = vperm.xlu0 %1625, %v1697_v34  }
  0x98   : > { %1497 = vmatmul.mubr.bf16.gmra.mrb[8].mxu0 %v1725_v29  ;;  %1513 = vmatmul.mubr.bf16.gmra.mrb[8].mxu1 %v1726_v30 }
  0x99   : > { %1500 = vmatprep.mubr.bf16.mxu0 %v1727_v37  ;;  %1516 = vmatprep.mubr.bf16.mxu1 %v1728_v38 }
  0xa0   : > { %1501 = vmatmul.mubr.bf16.gmra.mrb[12].mxu0 %v1729_v46  ;;  %1517 = vmatmul.mubr.bf16.gmra.mrb[12].mxu1 %v1730_v47 }
  0xf3   : > { %v2239_v48 = vpop.permute.xlu1 %1638  ;;  %v2241_v49 = vpop.permute.xlu0 %1627 }
  0xf4   : > { %v1641_v24 = vunpack.i.h.bf16 %v2239_v48  ;;  %v1640_v25 = vunpack.i.l.bf16 %v2239_v48  ;;  %v1630_v17 = vunpack.i.h.bf16 %v2241_v49  ;;  %v1629_v28 = vunpack.i.l.bf16 %v2241_v49 }
  0xf7   : > { %v2248_v50 = vpop.permute.xlu1 %1643  ;;  %v2250_v51 = vpop.permute.xlu0 %1632 }
  0xf8   : > { %v1646_v29 = vunpack.i.h.bf16 %v2248_v50  ;;  %v1645_v35 = vunpack.i.l.bf16 %v2248_v50  ;;  %v1635_v36 = vunpack.i.h.bf16 %v2250_v51  ;;  %v1634_v37 = vunpack.i.l.bf16 %v2250_v51 }
  0xfb   : > { %v2260_v4 = vpop.permute.xlu1 %1653  ;;  %v2262_v5 = vpop.permute.xlu0 %1648 }
  0xfc   : > { %v1656_v42 = vunpack.i.h.bf16 %v2260_v4  ;;  %v1655_v43 = vunpack.i.l.bf16 %v2260_v4  ;;  %v1651_v46 = vunpack.i.h.bf16 %v2262_v5  ;;  %v1650_v47 = vunpack.i.l.bf16 %v2262_v5 }
  0xff   : > { %v2277_v30 = vpop.permute.xlu1 %1663  ;;  %v2279_v31 = vpop.permute.xlu0 %1658 }
 0x103   : > { %v1674_v4 = vpop.permute.xlu1 %1673 }
 0x15b   : > { %v1490_v52 = vpop.f32.mrb[0].mxu0  ;;  %v1506_v53 = vpop.f32.mrb[0].mxu1 }
 0x15c   : > { %v623_v54 = vadd.f32 %v1490_v52, %v2246_v39  ;;  %v687_v55 = vadd.f32 %v1506_v53, %v2246_v39  ;;  %v614_v56 = vpop.f32.mrb[1].mxu0  ;;  %v678_v57 = vpop.f32.mrb[1].mxu1 }
 0x15d   : > { %v615_v58 = vadd.f32 %v2246_v39, %v614_v56  ;;  %v679_v59 = vadd.f32 %v2246_v39, %v678_v57  ;;  %v1491_v60 = vpop.f32.mrb[2].mxu0  ;;  %v1507_v61 = vpop.f32.mrb[2].mxu1  ;;  %v1665_v56 = vunpack.i.l.bf16 %v2277_v30 }
 0x15e   : > { %1731 = vtanh.f32 %v623_v54  ;;  %v626_v62 = vadd.f32 %v1491_v60, %v2246_v39  ;;  %v617_v63 = vpop.f32.mrb[3].mxu0  ;;  %v681_v0 = vpop.f32.mrb[3].mxu1  ;;  %v690_v1 = vadd.f32 %v1507_v61, %v2246_v39 }
 0x15f   : > { %1733 = vtanh.f32 %v687_v55  ;;  %v618_v2 = vadd.f32 %v2246_v39, %v617_v63  ;;  %v682_v3 = vadd.f32 %v2246_v39, %v681_v0  ;;  %v1666_v55 = vunpack.i.h.bf16 %v2277_v30 }
 0x160   : > { %1735 = vtanh.f32 %v615_v58 }
 0x161   : > { %1737 = vtanh.f32 %v679_v59 }
 0x162   : > { %1739 = vtanh.f32 %v626_v62  ;;  %v1661_v62 = vunpack.i.h.bf16 %v2279_v31 }
 0x163   : > { %1741 = vtanh.f32 %v690_v1  ;;  %v1494_v6 = vpop.f32.mrb[4].mxu0  ;;  %v1510_v7 = vpop.f32.mrb[4].mxu1 }
 0x164   : > { %1743 = vtanh.f32 %v618_v2  ;;  %v639_v8 = vadd.f32 %v1494_v6, %v2246_v39  ;;  %v703_v10 = vadd.f32 %v1510_v7, %v2246_v39  ;;  %v630_v11 = vpop.f32.mrb[5].mxu0  ;;  %v694_v12 = vpop.f32.mrb[5].mxu1 }
 0x165   : > { %1745 = vtanh.f32 %v682_v3  ;;  %v631_v13 = vadd.f32 %v2246_v39, %v630_v11  ;;  %v695_v14 = vadd.f32 %v2246_v39, %v694_v12  ;;  %v1495_v15 = vpop.f32.mrb[6].mxu0  ;;  %v1511_v16 = vpop.f32.mrb[6].mxu1 }
 0x166   : > { %1747 = vtanh.f32 %v639_v8  ;;  %v642_v18 = vadd.f32 %v1495_v15, %v2246_v39  ;;  %v633_v19 = vpop.f32.mrb[7].mxu0  ;;  %v697_v9 = vpop.f32.mrb[7].mxu1  ;;  %v706_v20 = vadd.f32 %v1511_v16, %v2246_v39 }
 0x167   : > { %1749 = vtanh.f32 %v703_v10  ;;  %v634_v22 = vadd.f32 %v2246_v39, %v633_v19  ;;  %v698_v26 = vadd.f32 %v2246_v39, %v697_v9  ;;  %v2304_v19 = vpop.permute.xlu0 %1668 }
 0x168   : > { %v1732_v21 = vpop.eup %1731  ;;  %1751 = vtanh.f32 %v631_v13 }
 0x169   : > { %v1734_v23 = vpop.eup %1733  ;;  %1753 = vtanh.f32 %v695_v14 }
 0x16a   : > { %v1736_v27 = vpop.eup %1735  ;;  %1755 = vtanh.f32 %v642_v18 }
 0x16b   : > { %v1738_v32 = vpop.eup %1737  ;;  %1757 = vtanh.f32 %v706_v20  ;;  %v1498_v38 = vpop.f32.mrb[8].mxu0 }
 0x16c   : > { %v1514_v40 = vpop.f32.mrb[8].mxu1  ;;  %v1740_v41 = vpop.eup %1739  ;;  %1759 = vtanh.f32 %v634_v22  ;;  %v655_v44 = vadd.f32 %v1498_v38, %v2246_v39 }
 0x16d   : > { %v646_v45 = vpop.f32.mrb[9].mxu0  ;;  %v710_v33 = vpop.f32.mrb[9].mxu1  ;;  %v2289_v49 = vpack.c.bf16 %v1740_v41, %v1732_v21  ;;  %1761 = vtanh.f32 %v698_v26  ;;  %v719_v58 = vadd.f32 %v1514_v40, %v2246_v39 }
 0x16e   : > { %v1742_v34 = vpop.eup %1741  ;;  %v1499_v52 = vpop.f32.mrb[10].mxu0  ;;  %v647_v0 = vadd.f32 %v2246_v39, %v646_v45  ;;  %v711_v1 = vadd.f32 %v2246_v39, %v710_v33  ;;  %1763 = vtanh.f32 %v655_v44 }
 0x16f   : > { %v1515_v53 = vpop.f32.mrb[10].mxu1  ;;  %v1744_v54 = vpop.eup %1743  ;;  %v2293_v57 = vpack.c.bf16 %v1742_v34, %v1734_v23  ;;  %v658_v6 = vadd.f32 %v1499_v52, %v2246_v39  ;;  %v791_v10 = vunpack.c.l.bf16 %v2289_v49  ;;  %v792_v11 = vunpack.c.h.bf16 %v2289_v49 }
 0x170   : > { %v649_v59 = vpop.f32.mrb[11].mxu0  ;;  %v713_v60 = vpop.f32.mrb[11].mxu1  ;;  %v773_v63 = vpack.c.bf16 %v1744_v54, %v1736_v27  ;;  %v722_v7 = vadd.f32 %v1515_v53, %v2246_v39  ;;  %1765 = vtanh.f32 %v719_v58 }
 0x171   : > { %v1746_v61 = vpop.eup %1745  ;;  %v807_v15 = vunpack.c.l.bf16 %v2293_v57  ;;  %1767 = vtanh.f32 %v647_v0  ;;  %v650_v22 = vadd.f32 %v2246_v39, %v649_v59  ;;  %v1126_v33 = vmul.f32 %v1634_v37, %v791_v10 }
 0x172   : > { %v1748_v2 = vpop.eup %1747  ;;  %v781_v3 = vpack.c.bf16 %v1746_v61, %v1738_v32  ;;  %v789_v12 = vunpack.c.l.bf16 %v773_v63  ;;  %v790_v13 = vunpack.c.h.bf16 %v773_v63  ;;  %v808_v32 = vunpack.c.h.bf16 %v2293_v57 }
 0x173   : > { %v1750_v8 = vpop.eup %1749  ;;  %v1502_v23 = vpop.f32.mrb[12].mxu0  ;;  %1769 = vtanh.f32 %v658_v6  ;;  %v1142_v53 = vmul.f32 %v1646_v29, %v807_v15  ;;  %v1660_v59 = vunpack.i.l.bf16 %v2279_v31  ;;  %v1670_v37 = vunpack.i.l.bf16 %v2304_v19 }
 0x174   : > { %v1752_v14 = vpop.eup %1751  ;;  %v805_v16 = vunpack.c.l.bf16 %v781_v3  ;;  %v806_v18 = vunpack.c.h.bf16 %v781_v3  ;;  %v1124_v20 = vmul.f32 %v1629_v28, %v789_v12  ;;  %v1125_v21 = vmul.f32 %v1630_v17, %v790_v13  ;;  %v1518_v26 = vpop.f32.mrb[12].mxu1 }
 0x175   : > { %v1754_v9 = vpop.eup %1753  ;;  %v662_v41 = vpop.f32.mrb[13].mxu0  ;;  %1771 = vtanh.f32 %v722_v7  ;;  %v1127_v0 = vmul.f32 %v1635_v36, %v792_v11  ;;  %v714_v50 = vadd.f32 %v2246_v39, %v713_v60  ;;  %v1143_v29 = vmul.f32 %v1650_v47, %v808_v32 }
 0x176   : > { %v1756_v27 = vpop.eup %1755  ;;  %v1140_v38 = vmul.f32 %v1641_v24, %v805_v16  ;;  %v1141_v40 = vmul.f32 %v1645_v35, %v806_v18  ;;  %v726_v44 = vpop.f32.mrb[13].mxu1  ;;  %v1156_v34 = vadd.f32 %v1125_v21, %v1124_v20  ;;  %1773 = vtanh.f32 %v650_v22 }
 0x177   : > { %v1758_v45 = vpop.eup %1757  ;;  %v776_v28 = vpack.c.bf16 %v1756_v27, %v1748_v2  ;;  %v1503_v17 = vpop.f32.mrb[14].mxu0  ;;  %1775 = vtanh.f32 %v711_v1  ;;  %v671_v47 = vadd.f32 %v1502_v23, %v2246_v39  ;;  %v735_v18 = vadd.f32 %v1518_v26, %v2246_v39 }
 0x178   : > { %v1519_v49 = vpop.f32.mrb[14].mxu1  ;;  %v1760_v52 = vpop.eup %1759  ;;  %v1177_v54 = vadd.f32 %v1141_v40, %v1140_v38  ;;  %v784_v57 = vpack.c.bf16 %v1758_v45, %v1750_v8  ;;  %v1157_v61 = vadd.f32 %v1156_v34, %v1126_v33  ;;  %1777 = vtanh.f32 %v714_v50 }
 0x179   : > { %v665_v58 = vpop.f32.mrb[15].mxu0  ;;  %v729_v24 = vpop.f32.mrb[15].mxu1  ;;  %v775_v63 = vpack.c.bf16 %v1760_v52, %v1752_v14  ;;  %v795_v6 = vunpack.c.l.bf16 %v776_v28  ;;  %v796_v12 = vunpack.c.h.bf16 %v776_v28  ;;  %v674_v27 = vadd.f32 %v1503_v17, %v2246_v39 }
 0x17a   : > { %v1762_v35 = vpop.eup %1761  ;;  %v1178_v2 = vadd.f32 %v1177_v54, %v1142_v53  ;;  %v1158_v13 = vadd.f32 %v1157_v61, %v1127_v0  ;;  %v811_v16 = vunpack.c.l.bf16 %v784_v57  ;;  %v812_v21 = vunpack.c.h.bf16 %v784_v57 }
 0x17b   : > { %v783_v3 = vpack.c.bf16 %v1762_v35, %v1754_v9  ;;  %v793_v7 = vunpack.c.l.bf16 %v775_v63  ;;  %v794_v8 = vunpack.c.h.bf16 %v775_v63  ;;  %v1764_v10 = vpop.eup %1763  ;;  %v1130_v20 = vmul.f32 %v1660_v59, %v795_v6  ;;  %v1679_v59 = vpop.permute.xlu0 %1678 }
 0x17c   : > { %v1179_v11 = vadd.f32 %v1178_v2, %v1143_v29  ;;  %v1766_v14 = vpop.eup %1765  ;;  %v1146_v26 = vmul.f32 %v1661_v62, %v811_v16  ;;  %v663_v40 = vadd.f32 %v2246_v39, %v662_v41  ;;  %1779 = vtanh.f32 %v671_v47 }
 0x17d   : > { %v809_v15 = vunpack.c.l.bf16 %v783_v3  ;;  %v1128_v51 = vmul.f32 %v1640_v25, %v793_v7  ;;  %v810_v36 = vunpack.c.h.bf16 %v783_v3  ;;  %v1768_v9 = vpop.eup %1767  ;;  %v1129_v1 = vmul.f32 %v1655_v43, %v794_v8 }
 0x17e   : > { %v1770_v48 = vpop.eup %1769  ;;  %v1131_v25 = vmul.f32 %v1665_v56, %v796_v12  ;;  %v727_v56 = vadd.f32 %v2246_v39, %v726_v44  ;;  %1781 = vtanh.f32 %v735_v18  ;;  %v738_v28 = vadd.f32 %v1519_v49, %v2246_v39 }
 0x17f   : > { %v1144_v60 = vmul.f32 %v1651_v46, %v809_v15  ;;  %v1159_v22 = vadd.f32 %v1158_v13, %v1128_v51  ;;  %v1145_v5 = vmul.f32 %v1656_v42, %v810_v36  ;;  %v1772_v23 = vpop.eup %1771  ;;  %v778_v38 = vpack.c.bf16 %v1770_v48, %v1764_v10 }
 0x180   : > { %v1774_v43 = vpop.eup %1773  ;;  %v2335_v33 = vpack.c.bf16 %v1772_v23, %v1766_v14  ;;  %v1147_v31 = vmul.f32 %v1666_v55, %v812_v21  ;;  %1783 = vtanh.f32 %v674_v27  ;;  %v666_v41 = vadd.f32 %v2246_v39, %v665_v58  ;;  %v1684_v58 = vpop.permute.xlu1 %1683 }
 0x181   : > { %v1180_v46 = vadd.f32 %v1179_v11, %v1144_v60  ;;  %v1160_v32 = vadd.f32 %v1159_v22, %v1129_v1  ;;  %v777_v34 = vpack.c.bf16 %v1774_v43, %v1768_v9  ;;  %1785 = vtanh.f32 %v663_v40  ;;  %v1776_v54 = vpop.eup %1775 }
 0x182   : > { %v730_v53 = vadd.f32 %v2246_v39, %v729_v24  ;;  %1787 = vtanh.f32 %v727_v56  ;;  %v1675_v35 = vunpack.i.l.bf16 %v1674_v4  ;;  %v799_v61 = vunpack.c.l.bf16 %v778_v38  ;;  %v1778_v55 = vpop.eup %1777 }
 0x183   : > { %v1181_v45 = vadd.f32 %v1180_v46, %v1145_v5  ;;  %v1161_v42 = vadd.f32 %v1160_v32, %v1130_v20  ;;  %v797_v17 = vunpack.c.l.bf16 %v777_v34  ;;  %v798_v52 = vunpack.c.h.bf16 %v777_v34  ;;  %v1689_v20 = vpop.permute.xlu0 %1688 }
 0x184   : > { %1789 = vtanh.f32 %v738_v28  ;;  %v1680_v49 = vunpack.i.l.bf16 %v1679_v59  ;;  %v800_v63 = vunpack.c.h.bf16 %v778_v38  ;;  %v785_v3 = vpack.c.bf16 %v1778_v55, %v1776_v54  ;;  %v1694_v5 = vpop.permute.xlu1 %1693 }
 0x185   : > { %v1182_v62 = vadd.f32 %v1181_v45, %v1146_v26  ;;  %v1162_v44 = vadd.f32 %v1161_v42, %v1131_v25  ;;  %v1132_v30 = vmul.f32 %v1670_v37, %v797_v17  ;;  %1791 = vtanh.f32 %v666_v41 }
 0x186   : > { %v1133_v0 = vmul.f32 %v1675_v35, %v798_v52  ;;  %1793 = vtanh.f32 %v730_v53  ;;  %v1671_v39 = vunpack.i.h.bf16 %v2304_v19  ;;  %v1685_v24 = vunpack.i.l.bf16 %v1684_v58  ;;  %v1780_v8 = vpop.eup %1779 }
 0x187   : > { %v1183_v57 = vadd.f32 %v1182_v62, %v1147_v31  ;;  %v1163_v2 = vadd.f32 %v1162_v44, %v1132_v30  ;;  %v1134_v50 = vmul.f32 %v1680_v49, %v799_v61  ;;  %v813_v6 = vunpack.c.l.bf16 %v785_v3 }
 0x188   : > { %v814_v7 = vunpack.c.h.bf16 %v785_v3  ;;  %v1676_v10 = vunpack.i.h.bf16 %v1674_v4  ;;  %v1782_v37 = vpop.eup %1781  ;;  %v1135_v12 = vmul.f32 %v1685_v24, %v800_v63  ;;  %v815_v13 = vunpack.c.l.bf16 %v2335_v33  ;;  %v1699_v4 = vpop.permute.xlu0 %1698 }
 0x189   : > { %v1164_v29 = vadd.f32 %v1163_v2, %v1133_v0  ;;  %v1148_v16 = vmul.f32 %v1671_v39, %v813_v6  ;;  %v1681_v36 = vunpack.i.h.bf16 %v1679_v59  ;;  %v816_v11 = vunpack.c.h.bf16 %v2335_v33  ;;  %v1704_v17 = vpop.permute.xlu1 %1703 }
 0x18a   : > { %v1784_v51 = vpop.eup %1783  ;;  %v1149_v60 = vmul.f32 %v1676_v10, %v814_v7  ;;  %v1686_v1 = vunpack.i.h.bf16 %v1684_v58  ;;  %v1690_v40 = vunpack.i.l.bf16 %v1689_v20  ;;  %v1691_v56 = vunpack.i.h.bf16 %v1689_v20 }
 0x18b   : > { %v1165_v15 = vadd.f32 %v1164_v29, %v1134_v50  ;;  %v1786_v14 = vpop.eup %1785  ;;  %v1184_v19 = vadd.f32 %v1183_v57, %v1148_v16  ;;  %v780_v47 = vpack.c.bf16 %v1784_v51, %v1780_v8  ;;  %v1150_v22 = vmul.f32 %v1681_v36, %v815_v13 }
 0x18c   : > { %v1788_v9 = vpop.eup %1787  ;;  %v1151_v23 = vmul.f32 %v1686_v1, %v816_v11  ;;  %v1695_v28 = vunpack.i.l.bf16 %v1694_v5  ;;  %v1696_v41 = vunpack.i.h.bf16 %v1694_v5  ;;  %v1700_v54 = vunpack.i.l.bf16 %v1699_v4  ;;  %v962_v11 = vld [vmem:[#allocation9] sm:$0x1] }
 0x18d   : > { %v1166_v18 = vadd.f32 %v1165_v15, %v1135_v12  ;;  %v1185_v48 = vadd.f32 %v1184_v19, %v1149_v60  ;;  %v803_v31 = vunpack.c.l.bf16 %v780_v47  ;;  %v804_v44 = vunpack.c.h.bf16 %v780_v47  ;;  %v963_v19 = vld [vmem:[#allocation9 + $0x1] sm:$0x1] }
 0x18e   : > { %v1790_v21 = vpop.eup %1789  ;;  %v1701_v59 = vunpack.i.h.bf16 %v1699_v4  ;;  %v1705_v49 = vunpack.i.l.bf16 %v1704_v17  ;;  %v1706_v0 = vunpack.i.h.bf16 %v1704_v17 }
 0x18f   : > { %v1792_v25 = vpop.eup %1791  ;;  %v788_v46 = vpack.c.bf16 %v1790_v21, %v1782_v37  ;;  %v1186_v26 = vadd.f32 %v1185_v48, %v1150_v22  ;;  %v1138_v63 = vmul.f32 %v1700_v54, %v803_v31 }
 0x190   : > { %v1794_v27 = vpop.eup %1793  ;;  %v779_v32 = vpack.c.bf16 %v1792_v25, %v1786_v14  ;;  %v1139_v39 = vmul.f32 %v1705_v49, %v804_v44 }
 0x191   : > { %v787_v38 = vpack.c.bf16 %v1794_v27, %v1788_v9  ;;  %v1187_v33 = vadd.f32 %v1186_v26, %v1151_v23  ;;  %v819_v52 = vunpack.c.l.bf16 %v788_v46  ;;  %v820_v61 = vunpack.c.h.bf16 %v788_v46 }
 0x192   : > { %v801_v43 = vunpack.c.l.bf16 %v779_v32  ;;  %v802_v45 = vunpack.c.h.bf16 %v779_v32 }
 0x193   : > { %v817_v42 = vunpack.c.l.bf16 %v787_v38  ;;  %v818_v34 = vunpack.c.h.bf16 %v787_v38  ;;  %v1154_v2 = vmul.f32 %v1701_v59, %v819_v52  ;;  %v1155_v50 = vmul.f32 %v1706_v0, %v820_v61 }
 0x194   : > { %v1136_v62 = vmul.f32 %v1690_v40, %v801_v43  ;;  %v1137_v57 = vmul.f32 %v1695_v28, %v802_v45 }
 0x195   : > { %v1152_v53 = vmul.f32 %v1691_v56, %v817_v42  ;;  %v1153_v30 = vmul.f32 %v1696_v41, %v818_v34 }
 0x196   : > { %v1167_v35 = vadd.f32 %v1166_v18, %v1136_v62 }
 0x197   : > { %v1188_v55 = vadd.f32 %v1187_v33, %v1152_v53 }
 0x198   : > { %v1168_v58 = vadd.f32 %v1167_v35, %v1137_v57 }
 0x199   : > { %v1189_v3 = vadd.f32 %v1188_v55, %v1153_v30 }
 0x19a   : > { %v1169_v24 = vadd.f32 %v1168_v58, %v1138_v63 }
 0x19b   : > { %v1190_v29 = vadd.f32 %v1189_v3, %v1154_v2 }
 0x19c   : > { %v1170_v6 = vadd.f32 %v1169_v24, %v1139_v39 }
 0x19d   : > { %v1191_v7 = vadd.f32 %v1190_v29, %v1155_v50 }
 0x19e   : > { %v1171_v8 = vrot.slane %v1170_v6, 4 }
 0x19f   : > { %v1192_v10 = vrot.slane %v1191_v7, 4 }
 0x1a0   : > { %v1172_v37 = vadd.f32 %v1171_v8, %v1170_v6 }
 0x1a1   : > { %v1193_v12 = vadd.f32 %v1192_v10, %v1191_v7 }
 0x1a2   : > { %v1173_v13 = vrot.slane %v1172_v37, 2 }
 0x1a3   : > { %v1194_v15 = vrot.slane %v1193_v12, 2 }
 0x1a4   : > { %v1174_v16 = vadd.f32 %v1173_v13, %v1172_v37 }
 0x1a5   : > { %v1195_v51 = vadd.f32 %v1194_v15, %v1193_v12 }
 0x1a6   : > { %v1175_v36 = vrot.slane %v1174_v16, 1 }
 0x1a7   : > { %v1196_v14 = vrot.slane %v1195_v51, 1 }
 0x1a8   : > { %v1176_v60 = vadd.f32 %v1175_v36, %v1174_v16 }
 0x1a9   : > { %v1197_v47 = vadd.f32 %v1196_v14, %v1195_v51 }
 0x1aa   : > { %v1198_v18 = vadd.f32 %v1176_v60, %v962_v11 }
 0x1ab   : > { %v1199_v9 = vadd.f32 %v1197_v47, %v963_v19 }
 0x1ac   : > { %1200 = vst [vmem:[#allocation9] sm:$0x1] %v1198_v18 }
 0x1ad   : > { %1201 = vst [vmem:[#allocation9 + $0x1] sm:$0x1] %v1199_v9 }
 0x1ae PF: > { %p1440_p1 = scmp.ne.s32.totalorder %s1900_s26, 1 }
 0x1af   : > { %v1208_v20 = vld [vmem:[%s2406_s5] sm:$0x1] (!%p1440_p1)  ;;  %v1922_v21 = vmov (!%p1440_p1), 0   ;;  %v1209_v1 = vld [vmem:[%s2406_s5 + $0x1] sm:$0x1] (!%p1440_p1)  ;;  %v1215_v22 = vlaneseq (!%p1440_p1) }
 0x1b0   : > { %1205 = sbr.rel (%p1440_p1) target bundleno = 570 (0x23a), region = 60  ;;  %1795 = vset.pattern.permute.xlu0 (!%p1440_p1), %v1922_v21 }
 0x1b1   : > { %1212 = vperm.xlu0 (!%p1440_p1), %1795, %v1208_v20   ;;  %v1216_v48 = vshrl.u32 (!%p1440_p1), %v1215_v22, 7 }
 0x1b3   : > { %v1217_v25 = vsub.s32 (!%p1440_p1), 0, %v1216_v48  ;;  %v1206_v46 = vld [vmem:[#allocation9] sm:$0x1] (!%p1440_p1) }
 0x1b4   : > { %v1207_v32 = vld [vmem:[#allocation9 + $0x1] sm:$0x1] (!%p1440_p1) }
 0x1b5   : > { %1221 = vperm.xlu0 (!%p1440_p1), %1795, %v1209_v1  }
 0x230   : > { %v1213_v5 = vpop.permute.xlu0 %1212 }
 0x231   : > { %v1218_v27 = vrot.slane %v1213_v5, %v1217_v25 }
 0x233   : > { %v1228_v23 = vmul.f32 %v1218_v27, %v1206_v46 }
 0x234   : > { %v1222_v26 = vpop.permute.xlu0 %1221 }
 0x235   : > { %1230 = vst [vmem:[#allocation9] sm:$0x1] %v1228_v23  ;;  %v1227_v38 = vrot.slane %v1222_v26, %v1217_v25 }
 0x237   : > { %v1229_v40 = vmul.f32 %v1227_v38, %v1207_v32 }
 0x239   : > { %1231 = vst [vmem:[#allocation9 + $0x1] sm:$0x1] %v1229_v40 }
 0x23a PF: > { %s2423_s26 = sadd.s32 4294967295, %s1908_s28   ;;  %s1923_s8 = smov [#allocation9]  }
 0x23b   : > { %p2357_p2 = scmp.eq.s32.totalorder %s2423_s26, 1  ;;  %s1242_s13 = sshll.u32 %s1923_s8, 4  ;;  %s1243_s13 = int_to_ptr.vmem [resolvable:$true] %s1242_s13 }
 0x23c   : > { %s1824_s16 = scalar_lea.vmem %s1243_s13, 32  ;;  %p1831_p9 = scmp.lt.s32.totalorder %s1243_s13, %s1243_s13 }
 0x23d   : > { %p1825_p4 = scmp.ne.s32.totalorder %s1243_s13, %s1824_s16  ;;  %p1832_p11 = scmp.lt.s32.totalorder %s1824_s16, %s1824_s16 }
 0x23f   : > { %p1826_p6 = pnand %p1825_p4, %p2357_p2  ;;  %p1833_p13 = por %p1832_p11, %p1831_p9 }
 0x241   : > { %p1827_p7 = pneg %p1826_p6 }
 0x243   : > { %p1834_p3 = pnand %p1833_p13, %p1827_p7 }
 0x245   : > { %1837 = shalt.err (!%p1834_p3)
}
 0x246   : > { %s1838_s10 = scalar_lea.hbm %s2407_s6, 32 }
 0x247   : > { %p1839_p5 = scmp.ne.s32.totalorder %s2407_s6, %s1838_s10  ;;  %p1844_p12 = scmp.lt.u32.totalorder %s1838_s10, %s2407_s6 }
 0x249   : > { %p1840_p8 = pnand %p1839_p5, %p2357_p2 }
 0x24b   : > { %p1841_p10 = pneg %p1840_p8 }
 0x24d   : > { %p1846_p0 = pnand %p1844_p12, %p1841_p10 }
 0x24f   : > { %1849 = shalt.err (!%p1846_p0)
}
 0x250   : > { %s1924_s23 = smov 16   ;;  %s1925_s30 = smov 1  }
 0x251   : > { %1550 = dma.vmem_to_hbm [thread:$0]  (%p2357_p2), %s1243_s13, 32, %s2407_s6, [#allocation6], %s1924_s23, %s1924_s23, %s1925_s30  }
 0x252   : > { %1883 = dma.done.wait (%p2357_p2), [#allocation6], 32  }
 0x253   : > { %1885 = vsyncadd (%p2357_p2), [#allocation6], 4294967264 }
 0x254 PF: > { %s22_s28 = sadd.s32 1, %s1908_s28   ;;  %s2425_s23 = smov %s1892_s24 }
 0x255   : > { %p19_p1 = scmp.ge.s32.totalorder %s22_s28, 4   ;;  %s2426_s24 = smov %s1896_s25 }
 0x256   : > { %s2427_s25 = smov %s2022_s11  ;;  %s2428_s26 = smov %s1904_s27 }
 0x257   : > { %s2429_s27 = smov %s2431_s29  ;;  %21 = sbr.rel (!%p19_p1) target bundleno = 8 (0x8), region = 109 }
 0x25e   :  { %1258 = vsyncpa [#allocation5], 1 }
 0x25f   :  { %1260 = vsyncpa [#allocation5 + $0x1], 1 }
 0x260   :  { %1261 = vsyncpa [#allocation8], 1 }
 0x261   :  { %1262 = vsyncpa [#allocation6], 1 }
 0x262   :  { %1264 = vsyncpa [#allocation6 + $0x1], 1 }

</bundles_post_ra>
